<compile_context>
chip_gen: v6e
topology: v6e:2x2x1
jax: 0.10.0
libtpu: 0.0.40
codegen_flags: <defaults>
</compile_context>

<pallas_src>
import jax
import jax.numpy as jnp
from jax.experimental import pallas as pl
from jax.experimental.pallas import tpu as pltpu

LANES = 128
ACC_SUBLANES = 8
MIN_KERNEL_ELEMS = LANES * ACC_SUBLANES  # below this, plain jnp is cheaper & safer

# Per-generation target bytes per input per block (double-buffered by Pallas:
# 2 inputs x 2 buffers x block stays well inside every scoped-VMEM default).
_GEN_BLOCK_BYTES = {"v7x": 2 << 20, "v6e": 2 << 20, "v5e": 1 << 20}
_GEN_NUM_CORES = {"v7x": 2}  # only v7x has 2 TensorCores per chip


def _round_up(v, m):
    return (v + m - 1) // m * m


def _tpu_generation():
    try:
        kind = jax.devices()[0].device_kind.lower()
    except Exception:
        return "unknown"
    if "v7" in kind:
        return "v7x"
    if "v6" in kind:
        return "v6e"
    if "v5" in kind:
        return "v5e"
    return "unknown"


def _make_mse_kernel(block_rows, blocks_per_core, blocks_total, valid_rows,
                     needs_mask):
    last_block = blocks_total - 1

    def _partial(d2):
        # Collapse the block onto an (8,128) vector accumulator with pure VPU
        # adds (leading-axis reduce); the one cross-lane reduce happens in the
        # wrapper on the tiny output.
        return jnp.sum(
            d2.reshape(block_rows // ACC_SUBLANES, ACC_SUBLANES, LANES), axis=0
        )[None]

    def kernel(cf_ref, x_ref, acc_ref):
        c = pl.program_id(0)   # core shard (size 1 except on v7x)
        i = pl.program_id(1)   # reduction step within shard

        @pl.when(i == 0)
        def _():
            acc_ref[...] = jnp.zeros_like(acc_ref)

        diff = cf_ref[...].astype(jnp.float32) - x_ref[...].astype(jnp.float32)
        d2 = diff * diff

        if not needs_mask:
            acc_ref[...] += _partial(d2)
        else:
            blk = c * blocks_per_core + i

            # Interior blocks: mask-free fast path (keeps VALU slack under DMA).
            @pl.when(blk < last_block)
            def _():
                acc_ref[...] += _partial(d2)

            # Last real block (ragged tail) and clamped duplicate blocks.
            @pl.when(blk >= last_block)
            def _():
                rows = jax.lax.broadcasted_iota(jnp.int32, (block_rows, LANES), 0)
                global_row = blk * block_rows + rows
                acc_ref[...] += _partial(
                    jnp.where(global_row < valid_rows, d2, 0.0))

    return kernel


def content_loss_forward(content_features, x):
    """Pallas equivalent of ContentLoss.forward: returns (x, mse_loss)."""
    assert content_features.shape == x.shape

    n_elems = x.size
    cf_flat = content_features.reshape(-1)
    x_flat = x.reshape(-1)

    def _jnp_sq_sum(a, b):
        d = a.astype(jnp.float32) - b.astype(jnp.float32)
        return jnp.sum(d * d)

    # Tiny inputs: grid/DMA overhead dominates and tiling degenerates.
    if n_elems < MIN_KERNEL_ELEMS:
        return x, _jnp_sq_sum(cf_flat, x_flat) / n_elems

    # Lane-ragged tail (< 128 elements): folded in with a tiny separate jnp
    # step instead of jnp.pad (which would copy both full tensors through HBM).
    n_main = (n_elems // LANES) * LANES
    if n_main != n_elems:
        tail_sq_sum = _jnp_sq_sum(cf_flat[n_main:], x_flat[n_main:])
        # TODO(synk): the prefix slice may still materialize one copy of each
        # input; a fully zero-copy path needs a 1-D in-kernel element mask.
        cf_flat = cf_flat[:n_main]
        x_flat = x_flat[:n_main]
    else:
        tail_sq_sum = jnp.float32(0.0)

    m = n_main // LANES
    cf2 = cf_flat.reshape(m, LANES)   # lane-dense view; reshape is a free no-op
    x2 = x_flat.reshape(m, LANES)

    gen = _tpu_generation()
    num_cores = _GEN_NUM_CORES.get(gen, 1)
    block_bytes = _GEN_BLOCK_BYTES.get(gen, 1 << 20)

    itemsize = jnp.dtype(x.dtype).itemsize
    # Sublane packing: 8 rows for f32, 16 for bf16, 32 for 8-bit dtypes.
    rows_multiple = max(ACC_SUBLANES, 32 // itemsize)
    # Bytes-based sizing: bf16 automatically gets 2x the rows of f32 so the
    # bytes moved per grid step stay constant.
    target_rows = max(
        rows_multiple,
        (block_bytes // (LANES * itemsize)) // rows_multiple * rows_multiple)
    block_rows = min(target_rows, _round_up(m, rows_multiple))

    blocks_total = pl.cdiv(m, block_rows)
    blocks_per_core = pl.cdiv(blocks_total, num_cores)
    needs_mask = (num_cores * blocks_per_core * block_rows) != m

    # global_row is computed in int32 inside the kernel.
    assert num_cores * blocks_per_core * block_rows < 2 ** 31

    def in_index_map(c, i):
        blk = c * blocks_per_core + i
        # Clamp so no DMA ever starts past the array; clamped (duplicate)
        # blocks are fully masked inside the kernel.
        return (jnp.minimum(blk, blocks_total - 1), 0)

    kernel = _make_mse_kernel(block_rows, blocks_per_core, blocks_total, m,
                              needs_mask)

    # Only CORE_PARALLEL guarantees the 2-TC split on v7x; single-TC chips get
    # a plain serial reduction (leading axis has size 1 there anyway).
    if num_cores > 1 and hasattr(pltpu, "CORE_PARALLEL"):
        dim_sems = (pltpu.CORE_PARALLEL, pltpu.ARBITRARY)
    elif num_cores > 1:
        dim_sems = ("parallel", "arbitrary")
    else:
        dim_sems = ("arbitrary", "arbitrary")

    partials = pl.pallas_call(
        kernel,
        out_shape=jax.ShapeDtypeStruct((num_cores, ACC_SUBLANES, LANES),
                                       jnp.float32),
        grid_spec=pltpu.PrefetchScalarGridSpec(
            num_scalar_prefetch=0,
            grid=(num_cores, blocks_per_core),
            in_specs=[
                pl.BlockSpec((block_rows, LANES), in_index_map),
                pl.BlockSpec((block_rows, LANES), in_index_map),
            ],
            out_specs=pl.BlockSpec((1, ACC_SUBLANES, LANES),
                                   lambda c, i: (c, 0, 0)),
        ),
        compiler_params=pltpu.CompilerParams(dimension_semantics=dim_sems),
    )(cf2, x2)

    loss = (jnp.sum(partials) + tail_sq_sum) / n_elems
    return x, loss


if __name__ == "__main__":
    key = jax.random.PRNGKey(0)
    k_cf, k_x = jax.random.split(key)

    # Small NCHW feature maps consistent with the module's usage.
    shape = (2, 4, 16, 16)
    content_features = jax.random.normal(k_cf, shape, dtype=jnp.float32)
    x = jax.random.normal(k_x, shape, dtype=jnp.float32)

    out, loss = content_loss_forward(content_features, x)
    out = jax.block_until_ready(out)
    loss = jax.block_until_ready(loss)

    # Sanity check against plain-JAX reference.
    ref_loss = jnp.mean((content_features - x) ** 2)
    assert out.shape == x.shape
    assert jnp.allclose(out, x)
    assert jnp.allclose(loss, ref_loss, rtol=1e-5, atol=1e-6)

    print("KERNEL_OK")
</pallas_src>

<mosaic_0001>
module attributes {stable_mosaic.version = 11 : i64} {
  func.func @kernel(%arg0: i32, %arg1: i32, %arg2: memref<16x128xf32, #tpu.memory_space<vmem>>, %arg3: memref<16x128xf32, #tpu.memory_space<vmem>>, %arg4: memref<1x8x128xf32, #tpu.memory_space<vmem>>) attributes {dimension_semantics = [#tpu.dimension_semantics<arbitrary>, #tpu.dimension_semantics<arbitrary>], iteration_bounds = array<i64: 1, 1>, scalar_prefetch = 0 : i64, scratch_operands = 0 : i64, tpu.core_type = #tpu.core_type<tc>, window_params = [{transform_indices = @transform_0, window_bounds = array<i64: 16, 128>}, {transform_indices = @transform_1, window_bounds = array<i64: 16, 128>}, {transform_indices = @transform_2, window_bounds = array<i64: 1, 8, 128>}]} {
    %c0_i32 = arith.constant 0 : i32
    %0 = arith.cmpi eq, %arg1, %c0_i32 : i32
    %1 = arith.extui %0 : i1 to i32
    %c0_i32_0 = arith.constant 0 : i32
    %2 = arith.cmpi ne, %1, %c0_i32_0 : i32
    scf.if %2 {
      %cst_10 = arith.constant 0.000000e+00 : f32
      %13 = vector.broadcast %cst_10 : f32 to vector<1x8x128xf32>
      %c0_11 = arith.constant 0 : index
      %c0_12 = arith.constant 0 : index
      %c0_13 = arith.constant 0 : index
      %14 = vector.load %arg4[%c0_11, %c0_12, %c0_13] : memref<1x8x128xf32, #tpu.memory_space<vmem>>, vector<1x8x128xf32>
      tpu.vector_store %arg4[%c0_11, %c0_12, %c0_13], %13 {strides = array<i32>} : memref<1x8x128xf32, #tpu.memory_space<vmem>>, vector<1x8x128xf32>,
    } else {
    }
    %c0 = arith.constant 0 : index
    %c0_1 = arith.constant 0 : index
    %3 = vector.load %arg2[%c0, %c0_1] : memref<16x128xf32, #tpu.memory_space<vmem>>, vector<16x128xf32>
    %c0_2 = arith.constant 0 : index
    %c0_3 = arith.constant 0 : index
    %4 = vector.load %arg3[%c0_2, %c0_3] : memref<16x128xf32, #tpu.memory_space<vmem>>, vector<16x128xf32>
    %5 = arith.subf %3, %4 : vector<16x128xf32>
    %6 = arith.mulf %5, %5 : vector<16x128xf32>
    %c0_4 = arith.constant 0 : index
    %c0_5 = arith.constant 0 : index
    %c0_6 = arith.constant 0 : index
    %7 = vector.load %arg4[%c0_4, %c0_5, %c0_6] : memref<1x8x128xf32, #tpu.memory_space<vmem>>, vector<1x8x128xf32>
    %8 = vector.shape_cast %6 : vector<16x128xf32> to vector<2x8x128xf32>
    %cst = arith.constant dense<0.000000e+00> : vector<8x128xf32>
    %9 = vector.multi_reduction <add>, %8, %cst [0] : vector<2x8x128xf32> to vector<8x128xf32>
    %10 = vector.shape_cast %9 : vector<8x128xf32> to vector<1x8x128xf32>
    %11 = arith.addf %7, %10 : vector<1x8x128xf32>
    %c0_7 = arith.constant 0 : index
    %c0_8 = arith.constant 0 : index
    %c0_9 = arith.constant 0 : index
    %12 = vector.load %arg4[%c0_7, %c0_8, %c0_9] : memref<1x8x128xf32, #tpu.memory_space<vmem>>, vector<1x8x128xf32>
    tpu.vector_store %arg4[%c0_7, %c0_8, %c0_9], %11 {strides = array<i32>} : memref<1x8x128xf32, #tpu.memory_space<vmem>>, vector<1x8x128xf32>,
    return
  }
  func.func @transform_0(%arg0: i32, %arg1: i32) -> (i32, i32) {
    %c1_i32 = arith.constant 1 : i32
    %0 = arith.muli %arg0, %c1_i32 : i32
    %1 = arith.addi %0, %arg1 : i32
    %c0_i32 = arith.constant 0 : i32
    %2 = arith.minsi %1, %c0_i32 : i32
    %c0_i32_0 = arith.constant 0 : i32
    %c0_i32_1 = arith.constant 0 : i32
    return %2, %c0_i32_0 : i32, i32
  }
  func.func @transform_1(%arg0: i32, %arg1: i32) -> (i32, i32) {
    %c1_i32 = arith.constant 1 : i32
    %0 = arith.muli %arg0, %c1_i32 : i32
    %1 = arith.addi %0, %arg1 : i32
    %c0_i32 = arith.constant 0 : i32
    %2 = arith.minsi %1, %c0_i32 : i32
    %c0_i32_0 = arith.constant 0 : i32
    %c0_i32_1 = arith.constant 0 : i32
    return %2, %c0_i32_0 : i32, i32
  }
  func.func @transform_2(%arg0: i32, %arg1: i32) -> (i32, i32, i32) {
    %c0_i32 = arith.constant 0 : i32
    %c0_i32_0 = arith.constant 0 : i32
    %c0_i32_1 = arith.constant 0 : i32
    return %arg0, %c0_i32, %c0_i32_0 : i32, i32, i32
  }
}

</mosaic_0001>

<bundles_post_ra>
// kernel: tpu_custom_call.1
= control target key start
LH: loop header
LB: loop body
LE: loop exit
PB: predicated region body
PF: predicated region fallthrough
CT: control target
= control target key end

     0   :  { %7 = vsyncpa [#allocation3], 0  ;;  %s198_s0 = inlined_call_operand.hbm [shape: f32[16,128], index: 0, kind: input, shape index: {}]   ;;  %s199_s1 = inlined_call_operand.hbm [shape: f32[16,128], index: 1, kind: input, shape index: {}]   ;;  %s200_s2 = inlined_call_operand.hbm [shape: f32[1,8,128], index: 2, kind: output, shape index: {}]  }
   0x1   :  { %8 = vsyncpa [#allocation6], 0 }
   0x2   :  { %9 = vsyncpa [#allocation4], 0  ;;  %s169_s9 = smov [#allocation2]  }
   0x3   :  { %s21_s10 = sshll.u32 %s169_s9, 4  ;;  %s22_s10 = int_to_ptr.vmem [resolvable:$true] %s21_s10 }
   0x4   :  { %s111_s11 = scalar_lea.vmem %s22_s10, 256  ;;  %p116_p1 = scmp.lt.s32.totalorder %s22_s10, %s22_s10 }
   0x5   :  { %p112_p0 = scmp.ne.s32.totalorder %s22_s10, %s111_s11  ;;  %p117_p2 = scmp.lt.s32.totalorder %s111_s11, %s111_s11 }
   0x7   :  { %p118_p3 = por %p117_p2, %p116_p1 }
   0x9   :  { %p119_p4 = pnand %p118_p3, %p112_p0 }
   0xb   :  { %122 = shalt.err (!%p119_p4)
}
   0xc   :  { %s170_s12 = smov 128   ;;  %s171_s13 = smov 8  }
   0xd   :  { %27 = dma.hbm_to_vmem [thread:$0]  %s198_s0, 256, %s22_s10, [#allocation3], %s170_s12, %s170_s12, %s171_s13  }
   0xe   :  { %s172_s16 = smov [#allocation5]  }
   0xf   :  { %s39_s17 = sshll.u32 %s172_s16, 4  ;;  %s40_s17 = int_to_ptr.vmem [resolvable:$true] %s39_s17 }
  0x10   :  { %s131_s18 = scalar_lea.vmem %s40_s17, 256  ;;  %p136_p6 = scmp.lt.s32.totalorder %s40_s17, %s40_s17 }
  0x11   :  { %p132_p5 = scmp.ne.s32.totalorder %s40_s17, %s131_s18  ;;  %p137_p7 = scmp.lt.s32.totalorder %s131_s18, %s131_s18 }
  0x13   :  { %p138_p8 = por %p137_p7, %p136_p6 }
  0x15   :  { %p139_p9 = pnand %p138_p8, %p132_p5 }
  0x17   :  { %142 = shalt.err (!%p139_p9)
}
  0x18   :  { %45 = dma.hbm_to_vmem [thread:$0]  %s199_s1, 256, %s40_s17, [#allocation6], %s170_s12, %s170_s12, %s171_s13  }
  0x19   :  { %163 = dma.done.wait [#allocation3], 256  }
  0x1a   :  { %164 = vsyncadd [#allocation3], 4294967040 }
  0x1b   :  { %165 = dma.done.wait [#allocation6], 256  }
  0x1c   :  { %166 = vsyncadd [#allocation6], 4294967040  ;;  %v65_v0 = vld [vmem:[#allocation2] sm:$0xff]  ;;  %v66_v1 = vld [vmem:[#allocation2 + $0x8] sm:$0xff]  ;;  %s173_s0 = smov [#allocation7]  }
  0x1d   :  { %v67_v2 = vld [vmem:[#allocation5] sm:$0xff]  ;;  %v68_v3 = vld [vmem:[#allocation5 + $0x8] sm:$0xff]  ;;  %s83_s21 = sshll.u32 %s173_s0, 4  ;;  %s84_s21 = int_to_ptr.vmem [resolvable:$true] %s83_s21 }
  0x1e   :  { %v69_v4 = vsub.f32 %v65_v0, %v67_v2  ;;  %v70_v5 = vsub.f32 %v66_v1, %v68_v3  ;;  %s143_s22 = scalar_lea.vmem %s84_s21, 128  ;;  %p148_p11 = scmp.lt.s32.totalorder %s84_s21, %s84_s21 }
  0x1f   :  { %p144_p10 = scmp.ne.s32.totalorder %s84_s21, %s143_s22  ;;  %p149_p12 = scmp.lt.s32.totalorder %s143_s22, %s143_s22 }
  0x20   :  { %v71_v6 = vmul.f32 %v69_v4, %v69_v4  ;;  %v72_v7 = vmul.f32 %v70_v5, %v70_v5 }
  0x21   :  { %p150_p13 = por %p149_p12, %p148_p11 }
  0x22   :  { %v74_v8 = vadd.f32 %v72_v7, %v71_v6 }
  0x23   :  { %p151_p0 = pnand %p150_p13, %p144_p10 }
  0x24   :  { %76 = vst [vmem:[#allocation7] sm:$0xff] %v74_v8 }
  0x25   :  { %154 = shalt.err (!%p151_p0)
}
  0x26   :  { %86 = dma.vmem_to_hbm [thread:$0]  %s84_s21, 128, %s200_s2, [#allocation4]  }
  0x27   :  { %167 = dma.done.wait [#allocation4], 128  }
  0x28   :  { %168 = vsyncadd [#allocation4], 4294967168 }
  0x29   :  { %90 = vsyncpa [#allocation3], 1 }
  0x2a   :  { %91 = vsyncpa [#allocation6], 1 }
  0x2b   :  { %92 = vsyncpa [#allocation4], 1 }

</bundles_post_ra>
